<compile_context>
chip_gen: v6e
topology: v6e:2x2x1
jax: 0.10.0
libtpu: 0.0.40
codegen_flags: <defaults>
</compile_context>

<pallas_src>
import functools

import jax
import jax.numpy as jnp
from jax.experimental import pallas as pl
from jax.experimental.pallas import tpu as pltpu


def _depth_to_space_kernel(x_ref, tw_ref, o_ref, *, bs, cp_t, h_t, w):
    """One (batch, cp-tile, h-tile) block per grid step.

    x_ref : (bs*bs, cp_t, h_t, w)   input view, C split as (b1*bs + b2, cp)
    tw_ref: (bs, w, w*bs)           one-hot lane-interleave matrices (per b2)
    o_ref : (cp_t, h_t*bs, w*bs)    output block
    """
    wout = w * bs
    mm_dtype = tw_ref.dtype

    for b1 in range(bs):
        # ---- W (lane) interleave: scatter w -> w*bs + b2 via one-hot matmul.
        # Each b2 hits disjoint output lanes; the add chain below is the
        # minimum the matmul formulation needs (no zero-init accumulator).
        acc = None
        for b2 in range(bs):
            slab = x_ref[b1 * bs + b2]                       # (cp_t, h_t, w)
            slab2 = slab.reshape(cp_t * h_t, w).astype(mm_dtype)
            part = jnp.dot(slab2, tw_ref[b2],
                           precision=jax.lax.Precision.HIGHEST,
                           preferred_element_type=jnp.float32)
            acc = part if acc is None else acc + part
        v = acc.reshape(cp_t, h_t, wout).astype(o_ref.dtype)

        # ---- H (sublane) interleave: direct strided store into rows h*bs + b1.
        o_ref[:, pl.ds(b1, h_t, stride=bs), :] = v


def _choose_tiles(cp, h, w, bs, elem_bytes, budget_bytes):
    """Largest (cp_tile, h_tile) whose double-buffered in+out blocks fit budget."""

    def per_step_bytes(cp_t, h_t):
        # input block and output block hold the same number of elements
        return 2 * bs * bs * cp_t * h_t * w * elem_bytes

    # h_tile must be a multiple of 8 (sublane) or the full h; cp_tile divides cp.
    h_cands = sorted({h} | {ht for ht in range(8, h, 8) if h % ht == 0})
    cp_cands = [d for d in range(1, cp + 1) if cp % d == 0]

    best, best_b = None, -1
    for cp_t in cp_cands:
        for h_t in h_cands:
            b = per_step_bytes(cp_t, h_t)
            if 2 * b <= budget_bytes and b > best_b:     # x2: double buffering
                best, best_b = (cp_t, h_t), b
    if best is None:                                     # nothing fits: smallest legal
        best = (1, min(h_cands))
    return best


def depth_to_space(x, block_size, *, vmem_budget_bytes=8 * 1024 * 1024):
    """Pallas TPU implementation of the PyTorch DepthToSpace forward pass."""
    n, c, h, w = x.shape
    bs = int(block_size)
    assert c % (bs * bs) == 0, (c, bs)
    cp = c // (bs * bs)
    hout, wout = h * bs, w * bs

    if bs == 1:
        return x  # identity

    # Dtype the one-hot matmul runs in: bf16 data stays bf16 (exact, since every
    # output element is 1.0 * one input element); everything else goes through
    # f32 with precision=HIGHEST so f32 data is not rounded to bf16 in the MXU.
    # TODO(synk): integer inputs go through the f32 path, exact only up to 2**24.
    mm_dtype = jnp.bfloat16 if x.dtype == jnp.bfloat16 else jnp.float32

    # Free (view-only) reshape: (N, C, H, W) -> (N, b1*bs + b2, cp, H, W).
    xr = x.reshape(n, bs * bs, cp, h, w)

    # Constant one-hot lane-interleave matrices (tiny, shared by every step):
    # tw[b2, w_in, w_out] = 1  iff  w_out == w_in*bs + b2
    tw = (jnp.arange(wout, dtype=jnp.int32)[None, None, :] ==
          (jnp.arange(w, dtype=jnp.int32)[None, :, None] * bs +
           jnp.arange(bs, dtype=jnp.int32)[:, None, None])).astype(mm_dtype)

    elem = jnp.dtype(x.dtype).itemsize
    cp_t, h_t = _choose_tiles(cp, h, w, bs, elem, vmem_budget_bytes)
    grid = (n, cp // cp_t, h // h_t)

    block_bytes = 2 * bs * bs * cp_t * h_t * w * elem        # in block + out block
    tw_bytes = tw.size * jnp.dtype(mm_dtype).itemsize
    vmem_limit = int(min(48 * 1024 * 1024,
                         max(32 * 1024 * 1024, 3 * block_bytes + 2 * tw_bytes)))

    kernel = functools.partial(_depth_to_space_kernel,
                               bs=bs, cp_t=cp_t, h_t=h_t, w=w)

    return pl.pallas_call(
        kernel,
        out_shape=jax.ShapeDtypeStruct((n, cp, hout, wout), x.dtype),
        grid_spec=pltpu.PrefetchScalarGridSpec(
            num_scalar_prefetch=0,
            grid=grid,
            in_specs=[
                pl.BlockSpec((None, bs * bs, cp_t, h_t, w),
                             lambda i, j, k: (i, 0, j, k, 0)),
                pl.BlockSpec((bs, w, wout), lambda i, j, k: (0, 0, 0)),
            ],
            out_specs=pl.BlockSpec((None, cp_t, h_t * bs, wout),
                                   lambda i, j, k: (i, j, k, 0)),
        ),
        compiler_params=pltpu.CompilerParams(
            dimension_semantics=("parallel", "parallel", "parallel"),
            vmem_limit_bytes=vmem_limit),
        cost_estimate=pl.CostEstimate(
            flops=2 * n * bs * bs * cp * h * w * wout,        # tiny one-hot matmuls
            transcendentals=0,
            bytes_accessed=2 * x.size * elem),                # HBM-bound data movement
    )(xr, tw)


if __name__ == "__main__":
    # Small deterministic configuration: x: (N=2, C=4, H=16, W=16), block_size=2
    N, C, H, W, BS = 2, 4, 16, 16, 2
    key = jax.random.PRNGKey(0)
    x = jax.random.normal(key, (N, C, H, W), jnp.float32)

    out = depth_to_space(x, BS)
    out = jax.block_until_ready(out)

    # Pure-JAX reference of the PyTorch forward.
    cp = C // (BS * BS)
    ref = x.reshape(N, BS, BS, cp, H, W)
    ref = jnp.transpose(ref, (0, 3, 4, 1, 5, 2))
    ref = ref.reshape(N, cp, H * BS, W * BS)

    assert out.shape == (N, cp, H * BS, W * BS), out.shape
    assert bool(jnp.all(jnp.isfinite(out)))
    # precision=HIGHEST keeps the one-hot "copy" matmul exact to (near) f32
    # rounding; a wrong permutation would give O(1) errors, bf16 rounding ~1e-2.
    err = float(jnp.max(jnp.abs(out - ref)))
    assert err < 1e-4, err
    print("KERNEL_OK")
</pallas_src>

<mosaic_0001>
module attributes {stable_mosaic.version = 11 : i64} {
  func.func @_depth_to_space_kernel(%arg0: i32, %arg1: i32, %arg2: i32, %arg3: memref<1x4x1x16x16xf32, #tpu.memory_space<vmem>>, %arg4: memref<2x16x32xf32, #tpu.memory_space<vmem>>, %arg5: memref<1x1x32x32xf32, #tpu.memory_space<vmem>>) attributes {dimension_semantics = [#tpu.dimension_semantics<parallel>, #tpu.dimension_semantics<parallel>, #tpu.dimension_semantics<parallel>], iteration_bounds = array<i64: 2, 1, 1>, scalar_prefetch = 0 : i64, scratch_operands = 0 : i64, tpu.core_type = #tpu.core_type<tc>, window_params = [{transform_indices = @transform_0, window_bounds = array<i64: 1, 4, 1, 16, 16>}, {pipeline_mode = #tpu.pipeline_mode<synchronous>, transform_indices = @transform_1, window_bounds = array<i64: 2, 16, 32>}, {transform_indices = @transform_2, window_bounds = array<i64: 1, 1, 32, 32>}]} {
    %c0 = arith.constant 0 : index
    %c0_0 = arith.constant 0 : index
    %c0_1 = arith.constant 0 : index
    %c0_2 = arith.constant 0 : index
    %c0_3 = arith.constant 0 : index
    %0 = vector.load %arg3[%c0, %c0_0, %c0_1, %c0_2, %c0_3] : memref<1x4x1x16x16xf32, #tpu.memory_space<vmem>>, vector<1x1x1x16x16xf32>
    %1 = vector.shape_cast %0 : vector<1x1x1x16x16xf32> to vector<1x16x16xf32>
    %2 = vector.shape_cast %1 : vector<1x16x16xf32> to vector<16x16xf32>
    %c0_4 = arith.constant 0 : index
    %c0_5 = arith.constant 0 : index
    %c0_6 = arith.constant 0 : index
    %3 = vector.load %arg4[%c0_4, %c0_5, %c0_6] : memref<2x16x32xf32, #tpu.memory_space<vmem>>, vector<1x16x32xf32>
    %4 = vector.shape_cast %3 : vector<1x16x32xf32> to vector<16x32xf32>
    %cst = arith.constant dense<0.000000e+00> : vector<16x32xf32>
    %5 = tpu.matmul %2, %4, %cst {dimension_numbers = #tpu.dot_dimension_numbers<[1], [0], [0], [1], [0, 0, 1, 1], [], []>, precision = #tpu.contract_precision<fp32>} : vector<16x16xf32>, vector<16x32xf32>, vector<16x32xf32> -> vector<16x32xf32>
    %c0_7 = arith.constant 0 : index
    %c1 = arith.constant 1 : index
    %c0_8 = arith.constant 0 : index
    %c0_9 = arith.constant 0 : index
    %c0_10 = arith.constant 0 : index
    %6 = vector.load %arg3[%c0_7, %c1, %c0_8, %c0_9, %c0_10] : memref<1x4x1x16x16xf32, #tpu.memory_space<vmem>>, vector<1x1x1x16x16xf32>
    %7 = vector.shape_cast %6 : vector<1x1x1x16x16xf32> to vector<1x16x16xf32>
    %8 = vector.shape_cast %7 : vector<1x16x16xf32> to vector<16x16xf32>
    %c1_11 = arith.constant 1 : index
    %c0_12 = arith.constant 0 : index
    %c0_13 = arith.constant 0 : index
    %9 = vector.load %arg4[%c1_11, %c0_12, %c0_13] : memref<2x16x32xf32, #tpu.memory_space<vmem>>, vector<1x16x32xf32>
    %10 = vector.shape_cast %9 : vector<1x16x32xf32> to vector<16x32xf32>
    %cst_14 = arith.constant dense<0.000000e+00> : vector<16x32xf32>
    %11 = tpu.matmul %8, %10, %cst_14 {dimension_numbers = #tpu.dot_dimension_numbers<[1], [0], [0], [1], [0, 0, 1, 1], [], []>, precision = #tpu.contract_precision<fp32>} : vector<16x16xf32>, vector<16x32xf32>, vector<16x32xf32> -> vector<16x32xf32>
    %12 = arith.addf %5, %11 : vector<16x32xf32>
    %13 = vector.shape_cast %12 : vector<16x32xf32> to vector<1x16x32xf32>
    %c0_15 = arith.constant 0 : index
    %c0_16 = arith.constant 0 : index
    %c0_17 = arith.constant 0 : index
    %c0_18 = arith.constant 0 : index
    %14 = tpu.strided_load %arg5[%c0_15, %c0_16, %c0_17, %c0_18] {strides = array<i32: 1, 1, 2, 1>} : memref<1x1x32x32xf32, #tpu.memory_space<vmem>>, vector<1x1x16x32xf32>
    %15 = vector.shape_cast %14 : vector<1x1x16x32xf32> to vector<1x16x32xf32>
    %16 = vector.shape_cast %13 : vector<1x16x32xf32> to vector<1x1x16x32xf32>
    tpu.strided_store %arg5[%c0_15, %c0_16, %c0_17, %c0_18], %16 {strides = array<i32: 1, 1, 2, 1>} : memref<1x1x32x32xf32, #tpu.memory_space<vmem>>, vector<1x1x16x32xf32>
    %c0_19 = arith.constant 0 : index
    %c2 = arith.constant 2 : index
    %c0_20 = arith.constant 0 : index
    %c0_21 = arith.constant 0 : index
    %c0_22 = arith.constant 0 : index
    %17 = vector.load %arg3[%c0_19, %c2, %c0_20, %c0_21, %c0_22] : memref<1x4x1x16x16xf32, #tpu.memory_space<vmem>>, vector<1x1x1x16x16xf32>
    %18 = vector.shape_cast %17 : vector<1x1x1x16x16xf32> to vector<1x16x16xf32>
    %19 = vector.shape_cast %18 : vector<1x16x16xf32> to vector<16x16xf32>
    %c0_23 = arith.constant 0 : index
    %c0_24 = arith.constant 0 : index
    %c0_25 = arith.constant 0 : index
    %20 = vector.load %arg4[%c0_23, %c0_24, %c0_25] : memref<2x16x32xf32, #tpu.memory_space<vmem>>, vector<1x16x32xf32>
    %21 = vector.shape_cast %20 : vector<1x16x32xf32> to vector<16x32xf32>
    %cst_26 = arith.constant dense<0.000000e+00> : vector<16x32xf32>
    %22 = tpu.matmul %19, %21, %cst_26 {dimension_numbers = #tpu.dot_dimension_numbers<[1], [0], [0], [1], [0, 0, 1, 1], [], []>, precision = #tpu.contract_precision<fp32>} : vector<16x16xf32>, vector<16x32xf32>, vector<16x32xf32> -> vector<16x32xf32>
    %c0_27 = arith.constant 0 : index
    %c3 = arith.constant 3 : index
    %c0_28 = arith.constant 0 : index
    %c0_29 = arith.constant 0 : index
    %c0_30 = arith.constant 0 : index
    %23 = vector.load %arg3[%c0_27, %c3, %c0_28, %c0_29, %c0_30] : memref<1x4x1x16x16xf32, #tpu.memory_space<vmem>>, vector<1x1x1x16x16xf32>
    %24 = vector.shape_cast %23 : vector<1x1x1x16x16xf32> to vector<1x16x16xf32>
    %25 = vector.shape_cast %24 : vector<1x16x16xf32> to vector<16x16xf32>
    %c1_31 = arith.constant 1 : index
    %c0_32 = arith.constant 0 : index
    %c0_33 = arith.constant 0 : index
    %26 = vector.load %arg4[%c1_31, %c0_32, %c0_33] : memref<2x16x32xf32, #tpu.memory_space<vmem>>, vector<1x16x32xf32>
    %27 = vector.shape_cast %26 : vector<1x16x32xf32> to vector<16x32xf32>
    %cst_34 = arith.constant dense<0.000000e+00> : vector<16x32xf32>
    %28 = tpu.matmul %25, %27, %cst_34 {dimension_numbers = #tpu.dot_dimension_numbers<[1], [0], [0], [1], [0, 0, 1, 1], [], []>, precision = #tpu.contract_precision<fp32>} : vector<16x16xf32>, vector<16x32xf32>, vector<16x32xf32> -> vector<16x32xf32>
    %29 = arith.addf %22, %28 : vector<16x32xf32>
    %30 = vector.shape_cast %29 : vector<16x32xf32> to vector<1x16x32xf32>
    %c0_35 = arith.constant 0 : index
    %c0_36 = arith.constant 0 : index
    %c1_37 = arith.constant 1 : index
    %c0_38 = arith.constant 0 : index
    %31 = tpu.strided_load %arg5[%c0_35, %c0_36, %c1_37, %c0_38] {strides = array<i32: 1, 1, 2, 1>} : memref<1x1x32x32xf32, #tpu.memory_space<vmem>>, vector<1x1x16x32xf32>
    %32 = vector.shape_cast %31 : vector<1x1x16x32xf32> to vector<1x16x32xf32>
    %33 = vector.shape_cast %30 : vector<1x16x32xf32> to vector<1x1x16x32xf32>
    tpu.strided_store %arg5[%c0_35, %c0_36, %c1_37, %c0_38], %33 {strides = array<i32: 1, 1, 2, 1>} : memref<1x1x32x32xf32, #tpu.memory_space<vmem>>, vector<1x1x16x32xf32>
    return
  }
  func.func @transform_0(%arg0: i32, %arg1: i32, %arg2: i32) -> (i32, i32, i32, i32, i32) {
    %c0_i32 = arith.constant 0 : i32
    %c0_i32_0 = arith.constant 0 : i32
    %c0_i32_1 = arith.constant 0 : i32
    return %arg0, %c0_i32, %arg1, %arg2, %c0_i32_0 : i32, i32, i32, i32, i32
  }
  func.func @transform_1(%arg0: i32, %arg1: i32, %arg2: i32) -> (i32, i32, i32) {
    %c0_i32 = arith.constant 0 : i32
    %c0_i32_0 = arith.constant 0 : i32
    %c0_i32_1 = arith.constant 0 : i32
    %c0_i32_2 = arith.constant 0 : i32
    return %c0_i32, %c0_i32_0, %c0_i32_1 : i32, i32, i32
  }
  func.func @transform_2(%arg0: i32, %arg1: i32, %arg2: i32) -> (i32, i32, i32, i32) {
    %c0_i32 = arith.constant 0 : i32
    %c0_i32_0 = arith.constant 0 : i32
    return %arg0, %arg1, %arg2, %c0_i32 : i32, i32, i32, i32
  }
}

</mosaic_0001>

<bundles_post_ra>
// kernel: tpu_custom_call.1
= control target key start
LH: loop header
LB: loop body
LE: loop exit
PB: predicated region body
PF: predicated region fallthrough
CT: control target
= control target key end

     0   :  { %7 = vsyncpa [#allocation3], 0  ;;  %s3348_s0 = inlined_call_operand.hbm [shape: f32[2,4,1,16,16], index: 0, kind: input, shape index: {}]   ;;  %s3349_s1 = inlined_call_operand.hbm [shape: f32[2,16,32], index: 1, kind: input, shape index: {}]   ;;  %s3350_s2 = inlined_call_operand.hbm [shape: f32[2,1,32,32], index: 2, kind: output, shape index: {}]  }
   0x1   :  { %9 = vsyncpa [#allocation3 + $0x1], 0 }
   0x2   :  { %10 = vsyncpa [#allocation6], 0 }
   0x3   :  { %11 = vsyncpa [#allocation4], 0 }
   0x4   :  { %13 = vsyncpa [#allocation4 + $0x1], 0  ;;  %s2923_s9 = smov 0   ;;  %s2925_s10 = smov 0  }
   0x5   :  { %s2927_s11 = smov 0   ;;  %s2929_s12 = smov 0  }
   0x6   :  { %s2931_s13 = smov 0   ;;  %s2933_s14 = smov 0  }
   0x7 LB: > { %s2392_s15 = sadd.s32 4294967295, %s2899_s14   ;;  %s2393_s16 = sadd.s32 4294967294, %s2899_s14   ;;  %s2899_s14 = sphi %s2933_s14, %s19_s14   ;;  %s2895_s13 = sphi %s2931_s13, %s3370_s13   ;;  %s2891_s12 = sphi %s2929_s12, %s3369_s12   ;;  %s2887_s11 = sphi %s2927_s11, %s3368_s11   ;;  %s2883_s10 = sphi %s2925_s10, %s3367_s10   ;;  %s2879_s9 = sphi %s2923_s9, %s3366_s9  }
   0x8   : > { %p62_p0 = scmp.ne.s32.totalorder %s2883_s10, %s2879_s9  ;;  %p2957_p1 = scmp.eq.s32.totalorder %s2392_s15, 0 }
   0x9   : > { %p2961_p2 = scmp.eq.s32.totalorder %s2392_s15, 1  ;;  %p117_p3 = scmp.eq.s32.totalorder %s2393_s16, 1 }
   0xa   : > { %p2967_p4 = por %p2957_p1, %p62_p0  ;;  %p2394_p5 = scmp.ge.s32.totalorder %s2899_s14, 1 }
   0xb   : > { %p2972_p6 = por %p117_p3, %p62_p0  ;;  %p124_p7 = scmp.lt.s32.totalorder %s2899_s14, 3 }
   0xc   : > { %s3355_s19 = scalar_select %p2967_p4, 1, 0 }
   0xd   : > { %s3356_s20 = scalar_select %p2972_p6, 1, 0 }
   0xe   : > { %p2977_p8 = pnand %p2394_p5, %p124_p7  ;;  %s2901_s22 = smov [#allocation5]  }
   0xf   : > { %s136_s23 = sshll.u32 %s2901_s22, 4  ;;  %s38_s25 = sadd.s32 1, %s2895_s13  ;;  %s137_s23 = int_to_ptr.vmem [resolvable:$true] %s136_s23 }
  0x10   : > { %p2692_p9 = pneg %p2977_p8  ;;  %s2772_s26 = scalar_lea.vmem %s137_s23, 512 }
  0x11   : > { %p2773_p13 = scmp.ne.s32.totalorder %s137_s23, %s2772_s26  ;;  %p2780_p5 = scmp.lt.s32.totalorder %s137_s23, %s137_s23 }
  0x12   : > { %p2986_p11 = pnand %p2692_p9, %p2957_p1  ;;  %p2781_p7 = scmp.lt.s32.totalorder %s2772_s26, %s2772_s26 }
  0x14   : > { %p2763_p12 = pneg %p2986_p11  ;;  %p2782_p6 = por %p2781_p7, %p2780_p5 }
  0x16   : > { %p2775_p0 = pnand %p2773_p13, %p2763_p12 }
  0x18   : > { %p2776_p3 = pneg %p2775_p0 }
  0x1a   : > { %p2783_p4 = pnand %p2782_p6, %p2776_p3 }
  0x1c   : > { %2786 = shalt.err (!%p2783_p4)
}
  0x1d   : > { %s3352_s27 = smov 128   ;;  %s2903_s28 = smov 8  }
  0x1e   : > { %2695 = dma.hbm_to_vmem [thread:$0]  (!%p2986_p11), %s3349_s1, 512, %s137_s23, [#allocation6], %s3352_s27, %s3352_s27, %s2903_s28  }
  0x1f   : > { %p40_p4 = scmp.ge.s32.totalorder %s38_s25, 2  ;;  %s49_s3 = sadd.s32 1, %s2887_s11 }
  0x20   : > { %p56_p6 = scmp.ne.s32.totalorder %s2887_s11, %s2883_s10  ;;  %p57_p9 = scmp.eq.s32.totalorder %s2899_s14, 0 }
  0x21   : > { %s3372_s25 = smov (%p40_p4, %s38_s25), 0  ;;  %p2705_p0 = scmp.lt.s32.totalorder %s2899_s14, 2 }
  0x22   : > { %p3007_p12 = por %p57_p9, %p56_p6  ;;  %p3013_p13 = por %p2961_p2, %p56_p6 }
  0x23   : > { %s42_s6 = ssub.s32 %s2895_s13, %s3372_s25  ;;  %s150_s7 = sand.u32 1, %s2887_s11  }
  0x24   : > { %p47_p11 = scmp.eq.s32.totalorder %s42_s6, 0  ;;  %s2397_s8 = sshll.u32 %s150_s7, 6 }
  0x25   : > { %s2418_s16 = sshll.u32 %s2895_s13, 10  ;;  %s154_s26 = scalar_lea.vmem [#allocation2], %s2397_s8 }
  0x26   : > { %s3022_s15 = scalar_select %p47_p11, %s2887_s11, %s49_s3  }
  0x27   : > { %s164_s24 = scalar_lea.hbm %s3348_s0, %s2418_s16  ;;  %s165_s29 = sshll.u32 %s154_s26, 4  ;;  %s166_s29 = int_to_ptr.vmem [resolvable:$true] %s165_s29 }
  0x28   : > { %p3030_p2 = pnand %p2705_p0, %p3007_p12  ;;  %s151_s30 = scalar_lea.sflag [#allocation3], %s150_s7 }
  0x29   : > { %s2800_s6 = scalar_lea.vmem %s166_s29, 1024  ;;  %s2904_s3 = smov [#allocation2]  }
  0x2a   : > { %p2789_p3 = pneg %p3030_p2  ;;  %p2801_p5 = scmp.ne.s32.totalorder %s166_s29, %s2800_s6 }
  0x2b   : > { %s2805_s27 = sshll.u32 %s2904_s3, 4  ;;  %s2806_s27 = int_to_ptr.vmem [resolvable:$false] %s2805_s27 }
  0x2c   : > { %p2803_p7 = pnand %p2801_p5, %p2789_p3  ;;  %s2807_s16 = scalar_lea.vmem %s2806_s27, 2048 }
  0x2d   : > { %p2808_p6 = scmp.lt.s32.totalorder %s166_s29, %s2806_s27  ;;  %p2809_p9 = scmp.lt.s32.totalorder %s2807_s16, %s2800_s6 }
  0x2e   : > { %p2804_p4 = pneg %p2803_p7 }
  0x2f   : > { %p2810_p11 = por %p2809_p9, %p2808_p6 }
  0x31   : > { %p2811_p10 = pnand %p2810_p11, %p2804_p4 }
  0x33   : > { %2814 = shalt.err (!%p2811_p10)
}
  0x34   : > { %s3362_s4 = smov 128   ;;  %177 = sbr.rel (%p2977_p8) target bundleno = 352 (0x160), region = 28 }
  0x35   : > { %2699 = dma.hbm_to_vmem [thread:$0]  (!%p3030_p2), %s164_s24, 1024, %s166_s29, %s151_s30, %s3362_s4, %s3362_s4, %s2903_s28  }
  0x36   : > { %s3044_s7 = sand.u32 (!%p2977_p8), 1, %s2883_s10   ;;  %p3363_p10 = scmp.ne.s32.totalorder (!%p2977_p8), %s3355_s19, 0 }
  0x37   : > { %s2401_s27 = sshll.u32 (!%p2977_p8), %s3044_s7, 6  ;;  %s180_s8 = scalar_lea.sflag (!%p2977_p8), [#allocation3], %s3044_s7 }
  0x38   : > { %s3048_s22 = scalar_lea.vmem (!%p2977_p8), [#allocation2], %s2401_s27 }
  0x39   : > { %2866 = dma.done.wait (%p3363_p10), %s180_s8, 1024  }
  0x3a   : > { %2868 = vsyncadd (%p3363_p10), %s180_s8, 4294966272 }
  0x3b   : > { %2870 = dma.done.wait (%p2957_p1), [#allocation6], 512  }
  0x3c   : > { %2872 = vsyncadd (%p2957_p1), [#allocation6], 4294966784  ;;  %vm220_vm0 = vcmask 130048   ;;  %v219_v0 = vld [vmem:[#allocation5 + $0x18] sm:$0xff]  ;;  %v218_v1 = vld [vmem:[#allocation5 + $0x10] sm:$0xff]  ;;  %s2403_s17 = sshll.u32 %s3044_s7, 5 }
  0x3d   : > { %v2404_v2 = vld [vmem:[%s3048_s22 + $0x10] sm:$0xff]  ;;  %v3059_v3 = vand.u32 4294901760, %v219_v0  ;;  %v3061_v4 = vand.u32 4294901760, %v218_v1  ;;  %v2405_v6 = vld [vmem:[%s3048_s22 + $0x18] sm:$0xff]  ;;  %v210_v12 = vld [vmem:[%s3048_s22] sm:$0xff]  ;;  %s3287_s19 = scalar_lea.vmem [#allocation7], %s2403_s17 }
  0x3e   : > { %v222_v5 = vsel %vm220_vm0, %v2404_v2, 0  ;;  %v225_v8 = vsel %vm220_vm0, %v2405_v6, 0  ;;  %v211_v14 = vld [vmem:[%s3048_s22 + $0x8] sm:$0xff]  ;;  %v730_v20 = vsel %vm220_vm0, %v210_v12, 0  ;;  %v212_v24 = vld [vmem:[#allocation5] sm:$0xff]  ;;  %v2409_v46 = vld [vmem:[%s3048_s22 + $0x30] sm:$0xff] }
  0x3f   : > { %v3065_v7 = vand.u32 4294901760, %v222_v5  ;;  %2516 = vmatprep.subr.mxu0 %v3059_v3  ;;  %v3070_v9 = vsub.f32 %v219_v0, %v3059_v3  ;;  %v3072_v10 = vand.u32 4294901760, %v225_v8  ;;  %v3075_v11 = vsub.f32 %v218_v1, %v3061_v4  ;;  %v213_v18 = vld [vmem:[#allocation5 + $0x8] sm:$0xff]  ;;  %v2410_v49 = vld [vmem:[%s3048_s22 + $0x38] sm:$0xff]  ;;  %v2407_v63 = vld [vmem:[%s3048_s22 + $0x20] sm:$0xff]  ;;  %s2288_s21 = sshll.u32 %s3287_s19, 4  ;;  %s3293_s21 = int_to_ptr.vmem [resolvable:$true] %s2288_s21 }
  0x40   : > { %2517 = vmatpush3.msra.mxu0 %v3059_v3  ;;  %v733_v25 = vsel %vm220_vm0, %v211_v14, 0  ;;  %v3098_v27 = vand.u32 4294901760, %v213_v18  ;;  %v3104_v31 = vand.u32 4294901760, %v730_v20  ;;  %v3106_v33 = vand.u32 4294901760, %v212_v24  ;;  %v2408_v1 = vld [vmem:[%s3048_s22 + $0x28] sm:$0xff]  ;;  %s2419_s28 = sshll.u32 %s2891_s12, 9 }
  0x41   : > { %v295_v13 = vsub.f32 %v222_v5, %v3065_v7  ;;  %2527 = vmatprep.mubr.f32.mxu1 %v3065_v7  ;;  %2518 = vmatprep.subr.mxu0 %v3061_v4  ;;  %v3084_v15 = vand.u32 4294901760, %v3070_v9  ;;  %v305_v16 = vsub.f32 %v225_v8, %v3072_v10  ;;  %v3088_v17 = vand.u32 4294901760, %v3075_v11  ;;  %s3298_s26 = scalar_lea.hbm %s3350_s2, %s2419_s28  ;;  %s2271_s29 = scalar_lea.sflag [#allocation4], %s3044_s7 }
  0x42   : > { %2519 = vmatpush3.msra.mxu0 %v3061_v4  ;;  %v3108_v34 = vand.u32 4294901760, %v733_v25  ;;  %v3113_v36 = vsub.f32 %v213_v18, %v3098_v27  ;;  %v3117_v37 = vsub.f32 %v730_v20, %v3104_v31  ;;  %v3125_v39 = vsub.f32 %v212_v24, %v3106_v33  ;;  %s2815_s12 = scalar_lea.vmem %s3293_s21, 512  ;;  %s2905_s18 = smov [#allocation7]  }
  0x43   : > { %v296_v19 = vand.u32 4294901760, %v295_v13  ;;  %v346_v21 = vsub.f32 %v3070_v9, %v3084_v15  ;;  %v306_v22 = vand.u32 4294901760, %v305_v16  ;;  %v353_v23 = vsub.f32 %v3075_v11, %v3088_v17  ;;  %2530 = vmatprep.subr.mxu0 %v3070_v9  ;;  %p2816_p1 = scmp.ne.s32.totalorder %s3293_s21, %s2815_s12  ;;  %s2819_s30 = sshll.u32 %s2905_s18, 4  ;;  %s2820_s30 = int_to_ptr.vmem [resolvable:$false] %s2819_s30 }
  0x44   : > { %v3122_v38 = vsub.f32 %v733_v25, %v3108_v34  ;;  %v3132_v40 = vand.u32 4294901760, %v3113_v36  ;;  %v804_v41 = vand.u32 4294901760, %v3117_v37  ;;  %v3139_v43 = vand.u32 4294901760, %v3125_v39  ;;  %s2821_s6 = scalar_lea.vmem %s2820_s30, 1024  ;;  %p2822_p0 = scmp.lt.s32.totalorder %s3293_s21, %s2820_s30 }
  0x45   : > { %v297_v26 = vsub.f32 %v295_v13, %v296_v19  ;;  %v3100_v28 = vand.u32 4294901760, %v346_v21  ;;  %v307_v29 = vsub.f32 %v305_v16, %v306_v22  ;;  %v3102_v30 = vand.u32 4294901760, %v353_v23  ;;  %p2817_p8 = pnand %p2816_p1, %p3013_p13  ;;  %p2823_p2 = scmp.lt.s32.totalorder %s2821_s6, %s2815_s12 }
  0x46   : > { %v814_v42 = vand.u32 4294901760, %v3122_v38  ;;  %v854_v44 = vsub.f32 %v3113_v36, %v3132_v40  ;;  %v805_v45 = vsub.f32 %v3117_v37, %v804_v41  ;;  %v861_v48 = vsub.f32 %v3125_v39, %v3139_v43 }
  0x47   : > { %v298_v32 = vand.u32 4294901760, %v297_v26  ;;  %2523 = vmatprep.subr.mxu1 %v3100_v28  ;;  %v308_v35 = vand.u32 4294901760, %v307_v29  ;;  %v1251_v51 = vsel %vm220_vm0, %v2409_v46, 0  ;;  %v1254_v53 = vsel %vm220_vm0, %v2410_v49, 0  ;;  %p2818_p12 = pneg %p2817_p8  ;;  %p2824_p3 = por %p2823_p2, %p2822_p0 }
  0x48   : > { %2524 = vmatpush3.msra.mxu1 %v3100_v28  ;;  %v815_v47 = vsub.f32 %v3122_v38, %v814_v42  ;;  %v3159_v50 = vand.u32 4294901760, %v854_v44  ;;  %v806_v52 = vand.u32 4294901760, %v805_v45  ;;  %v3167_v55 = vand.u32 4294901760, %v861_v48 }
  0x49   : > { %2520 = vmatprep.mubr.f32.mxu0 %v298_v32  ;;  %2525 = vmatprep.subr.mxu1 %v3102_v30  ;;  %v3171_v56 = vand.u32 4294901760, %v1251_v51  ;;  %v3175_v57 = vand.u32 4294901760, %v1254_v53  ;;  %v1759_v2 = vsel %vm220_vm0, %v2407_v63, 0  ;;  %v1762_v6 = vsel %vm220_vm0, %v2408_v1, 0  ;;  %p2825_p5 = pnand %p2824_p3, %p2818_p12 }
  0x4a   : > { %2521 = vmatmul.mubr.f32.vlgmr.msra.gmra.mxu0 %v308_v35  ;;  %2526 = vmatpush3.msra.mxu1 %v3102_v30  ;;  %v816_v54 = vand.u32 4294901760, %v815_v47  ;;  %v3221_v8 = vand.u32 4294901760, %v1759_v2 }
  0x4b   : > { %2531 = vmatpush3.msra.mxu0 %v3070_v9  ;;  %2528 = vmatmul.mubr.f32.vlgmr.msra.gmra.mxu1 %v3072_v10  ;;  %v3182_v58 = vsub.f32 %v1251_v51, %v3171_v56  ;;  %v3187_v59 = vsub.f32 %v1254_v53, %v3175_v57 }
  0x4c   : > { %2532 = vmatprep.subr.mxu0 %v3075_v11  ;;  %2537 = vmatprep.subr.mxu1 %v3059_v3  ;;  %v1832_v12 = vsub.f32 %v1759_v2, %v3221_v8 }
  0x4d   : > { %2533 = vmatpush3.msra.mxu0 %v3075_v11  ;;  %2534 = vmatprep.mubr.f32.mxu0 %v295_v13  ;;  %v1325_v60 = vand.u32 4294901760, %v3182_v58  ;;  %v1335_v61 = vand.u32 4294901760, %v3187_v59 }
  0x4e   : > { %2538 = vmatpush3.msra.mxu1 %v3059_v3  ;;  %2535 = vmatmul.mubr.f32.vlgmr.msra.gmra.mxu0 %v305_v16  ;;  %v1833_v14 = vand.u32 4294901760, %v1832_v12 }
  0x4f   : > { %2539 = vmatprep.subr.mxu1 %v3061_v4  ;;  %2544 = vmatprep.subr.mxu0 %v3084_v15  ;;  %v1326_v62 = vsub.f32 %v3182_v58, %v1325_v60  ;;  %v1336_v0 = vsub.f32 %v3187_v59, %v1335_v61 }
  0x50   : > { %2540 = vmatpush3.msra.mxu1 %v3061_v4  ;;  %2541 = vmatprep.mubr.f32.mxu1 %v296_v19 }
  0x51   : > { %2545 = vmatpush3.msra.mxu0 %v3084_v15  ;;  %2542 = vmatmul.mubr.f32.vlgmr.msra.gmra.mxu1 %v306_v22  ;;  %v1327_v5 = vand.u32 4294901760, %v1326_v62 }
  0x52   : > { %2546 = vmatprep.subr.mxu0 %v3088_v17  ;;  %2551 = vmatprep.subr.mxu1 %v3059_v3 }
  0x53   : > { %2547 = vmatpush3.msra.mxu0 %v3088_v17  ;;  %2548 = vmatprep.mubr.f32.mxu0 %v3065_v7 }
  0x54   : > { %2552 = vmatpush3.msra.mxu1 %v3059_v3  ;;  %2549 = vmatmul.mubr.f32.vlgmr.msra.gmra.mxu0 %v3072_v10 }
  0x55   : > { %2553 = vmatprep.subr.mxu1 %v3061_v4  ;;  %2558 = vmatprep.subr.mxu0 %v3098_v27 }
  0x56   : > { %2554 = vmatpush3.msra.mxu1 %v3061_v4  ;;  %2555 = vmatprep.mubr.f32.mxu1 %v3065_v7  ;;  %v1337_v7 = vand.u32 4294901760, %v1336_v0 }
  0x57   : > { %2559 = vmatpush3.msra.mxu0 %v3098_v27  ;;  %2556 = vmatmul.mubr.f32.vlgmr.msra.gmra.mxu1 %v3072_v10  ;;  %v3225_v10 = vand.u32 4294901760, %v1762_v6 }
  0x58   : > { %2560 = vmatprep.subr.mxu0 %v3106_v33  ;;  %2565 = vmatprep.subr.mxu1 %v3159_v50 }
  0x59   : > { %2561 = vmatpush3.msra.mxu0 %v3106_v33  ;;  %2562 = vmatprep.mubr.f32.mxu0 %v806_v52  ;;  %v1842_v13 = vsub.f32 %v1762_v6, %v3225_v10 }
  0x5a   : > { %2566 = vmatpush3.msra.mxu1 %v3159_v50  ;;  %2563 = vmatmul.mubr.f32.vlgmr.msra.gmra.mxu0 %v816_v54 }
  0x5b   : > { %2567 = vmatprep.subr.mxu1 %v3167_v55  ;;  %2572 = vmatprep.subr.mxu0 %v3113_v36 }
  0x5c   : > { %2568 = vmatpush3.msra.mxu1 %v3167_v55  ;;  %2569 = vmatprep.mubr.f32.mxu1 %v3104_v31 }
  0x5d   : > { %2573 = vmatpush3.msra.mxu0 %v3113_v36  ;;  %2570 = vmatmul.mubr.f32.vlgmr.msra.gmra.mxu1 %v3108_v34 }
  0x5e   : > { %2574 = vmatprep.subr.mxu0 %v3125_v39  ;;  %2579 = vmatprep.subr.mxu1 %v3098_v27 }
  0x5f   : > { %2575 = vmatpush3.msra.mxu0 %v3125_v39  ;;  %2576 = vmatprep.mubr.f32.mxu0 %v3117_v37 }
  0x60   : > { %2580 = vmatpush3.msra.mxu1 %v3098_v27  ;;  %2577 = vmatmul.mubr.f32.vlgmr.msra.gmra.mxu0 %v3122_v38 }
  0x61   : > { %2581 = vmatprep.subr.mxu1 %v3106_v33  ;;  %2586 = vmatprep.subr.mxu0 %v3132_v40 }
  0x62   : > { %2582 = vmatpush3.msra.mxu1 %v3106_v33  ;;  %2583 = vmatprep.mubr.f32.mxu1 %v804_v41 }
  0x63   : > { %2587 = vmatpush3.msra.mxu0 %v3132_v40  ;;  %2584 = vmatmul.mubr.f32.vlgmr.msra.gmra.mxu1 %v814_v42 }
  0x64   : > { %2588 = vmatprep.subr.mxu0 %v3139_v43  ;;  %2593 = vmatprep.subr.mxu1 %v3098_v27 }
  0x65   : > { %2589 = vmatpush3.msra.mxu0 %v3139_v43  ;;  %2590 = vmatprep.mubr.f32.mxu0 %v3104_v31 }
  0x66   : > { %2594 = vmatpush3.msra.mxu1 %v3098_v27  ;;  %2591 = vmatmul.mubr.f32.vlgmr.msra.gmra.mxu0 %v3108_v34 }
  0x67   : > { %2595 = vmatprep.subr.mxu1 %v3106_v33  ;;  %2600 = vmatprep.subr.mxu0 %v3059_v3 }
  0x68   : > { %2596 = vmatpush3.msra.mxu1 %v3106_v33  ;;  %2597 = vmatprep.mubr.f32.mxu1 %v3104_v31 }
  0x69   : > { %2601 = vmatpush3.msra.mxu0 %v3059_v3  ;;  %2598 = vmatmul.mubr.f32.vlgmr.msra.gmra.mxu1 %v3108_v34 }
  0x6a   : > { %2602 = vmatprep.subr.mxu0 %v3061_v4  ;;  %2607 = vmatprep.subr.mxu1 %v3100_v28 }
  0x6b   : > { %2603 = vmatpush3.msra.mxu0 %v3061_v4  ;;  %2604 = vmatprep.mubr.f32.mxu0 %v1327_v5 }
  0x6c   : > { %2608 = vmatpush3.msra.mxu1 %v3100_v28  ;;  %2605 = vmatmul.mubr.f32.vlgmr.msra.gmra.mxu0 %v1337_v7 }
  0x6d   : > { %2609 = vmatprep.subr.mxu1 %v3102_v30  ;;  %2614 = vmatprep.subr.mxu0 %v3070_v9 }
  0x6e   : > { %2610 = vmatpush3.msra.mxu1 %v3102_v30  ;;  %2611 = vmatprep.mubr.f32.mxu1 %v3171_v56 }
  0x6f   : > { %2615 = vmatpush3.msra.mxu0 %v3070_v9  ;;  %2612 = vmatmul.mubr.f32.vlgmr.msra.gmra.mxu1 %v3175_v57  ;;  %v1843_v9 = vand.u32 4294901760, %v1842_v13 }
  0x70   : > { %2616 = vmatprep.subr.mxu0 %v3075_v11  ;;  %2621 = vmatprep.subr.mxu1 %v3059_v3 }
  0x71   : > { %2617 = vmatpush3.msra.mxu0 %v3075_v11  ;;  %2618 = vmatprep.mubr.f32.mxu0 %v3182_v58  ;;  %v1834_v11 = vsub.f32 %v1832_v12, %v1833_v14  ;;  %v1844_v16 = vsub.f32 %v1842_v13, %v1843_v9 }
  0x72   : > { %2622 = vmatpush3.msra.mxu1 %v3059_v3  ;;  %2619 = vmatmul.mubr.f32.vlgmr.msra.gmra.mxu0 %v3187_v59 }
  0x73   : > { %2623 = vmatprep.subr.mxu1 %v3061_v4  ;;  %2628 = vmatprep.subr.mxu0 %v3084_v15  ;;  %v1845_v18 = vand.u32 4294901760, %v1844_v16 }
  0x74   : > { %2624 = vmatpush3.msra.mxu1 %v3061_v4  ;;  %2625 = vmatprep.mubr.f32.mxu1 %v1325_v60 }
  0x75   : > { %2629 = vmatpush3.msra.mxu0 %v3084_v15  ;;  %2626 = vmatmul.mubr.f32.vlgmr.msra.gmra.mxu1 %v1335_v61  ;;  %v1835_v15 = vand.u32 4294901760, %v1834_v11 }
  0x76   : > { %2630 = vmatprep.subr.mxu0 %v3088_v17  ;;  %2635 = vmatprep.subr.mxu1 %v3059_v3 }
  0x77   : > { %2631 = vmatpush3.msra.mxu0 %v3088_v17  ;;  %2632 = vmatprep.mubr.f32.mxu0 %v3171_v56 }
  0x78   : > { %2636 = vmatpush3.msra.mxu1 %v3059_v3  ;;  %2633 = vmatmul.mubr.f32.vlgmr.msra.gmra.mxu0 %v3175_v57 }
  0x79   : > { %2637 = vmatprep.subr.mxu1 %v3061_v4  ;;  %2642 = vmatprep.subr.mxu0 %v3098_v27 }
  0x7a   : > { %2638 = vmatpush3.msra.mxu1 %v3061_v4  ;;  %2639 = vmatprep.mubr.f32.mxu1 %v3171_v56 }
  0x7b   : > { %2643 = vmatpush3.msra.mxu0 %v3098_v27  ;;  %2640 = vmatmul.mubr.f32.vlgmr.msra.gmra.mxu1 %v3175_v57 }
  0x7c   : > { %2644 = vmatprep.subr.mxu0 %v3106_v33  ;;  %2649 = vmatprep.subr.mxu1 %v3159_v50 }
  0x7d   : > { %2645 = vmatpush3.msra.mxu0 %v3106_v33  ;;  %2646 = vmatprep.mubr.f32.mxu0 %v1835_v15 }
  0x7e   : > { %2650 = vmatpush3.msra.mxu1 %v3159_v50  ;;  %2647 = vmatmul.mubr.f32.vlgmr.msra.gmra.mxu0 %v1845_v18 }
  0x7f   : > { %2651 = vmatprep.subr.mxu1 %v3167_v55  ;;  %2656 = vmatprep.subr.mxu0 %v3113_v36 }
  0x80   : > { %2652 = vmatpush3.msra.mxu1 %v3167_v55  ;;  %2653 = vmatprep.mubr.f32.mxu1 %v3221_v8 }
  0x81   : > { %2657 = vmatpush3.msra.mxu0 %v3113_v36  ;;  %2654 = vmatmul.mubr.f32.vlgmr.msra.gmra.mxu1 %v3225_v10 }
  0x82   : > { %2658 = vmatprep.subr.mxu0 %v3125_v39  ;;  %2663 = vmatprep.subr.mxu1 %v3098_v27 }
  0x83   : > { %2659 = vmatpush3.msra.mxu0 %v3125_v39  ;;  %2660 = vmatprep.mubr.f32.mxu0 %v1832_v12 }
  0x84   : > { %2664 = vmatpush3.msra.mxu1 %v3098_v27  ;;  %2661 = vmatmul.mubr.f32.vlgmr.msra.gmra.mxu0 %v1842_v13 }
  0x85   : > { %2665 = vmatprep.subr.mxu1 %v3106_v33  ;;  %2670 = vmatprep.subr.mxu0 %v3132_v40 }
  0x86   : > { %2666 = vmatpush3.msra.mxu1 %v3106_v33  ;;  %2667 = vmatprep.mubr.f32.mxu1 %v1833_v14 }
  0x87   : > { %2671 = vmatpush3.msra.mxu0 %v3132_v40  ;;  %2668 = vmatmul.mubr.f32.vlgmr.msra.gmra.mxu1 %v1843_v9 }
  0x88   : > { %2672 = vmatprep.subr.mxu0 %v3139_v43  ;;  %2677 = vmatprep.subr.mxu1 %v3098_v27 }
  0x89   : > { %2673 = vmatpush3.msra.mxu0 %v3139_v43  ;;  %2674 = vmatprep.mubr.f32.mxu0 %v3221_v8 }
  0x8a   : > { %2678 = vmatpush3.msra.mxu1 %v3098_v27  ;;  %2675 = vmatmul.mubr.f32.vlgmr.msra.gmra.mxu0 %v3225_v10 }
  0x8b   : > { %2679 = vmatprep.subr.mxu1 %v3106_v33  ;;  %2681 = vmatprep.mubr.f32.mxu1 %v3221_v8 }
  0x8c   : > { %2680 = vmatpush3.msra.mxu1 %v3106_v33 }
  0x8d   : > { %2682 = vmatmul.mubr.f32.vlgmr.msra.gmra.mxu1 %v3225_v10 }
 0x10a   : > { %v2522_v3 = vpop.f32.mrf.mxu0 }
 0x10b   : > { %v2529_v17 = vpop.f32.mrf.mxu1 }
 0x10c   : > { %v300_v4 = vpop.f32.mrf.mxu0  ;;  %v398_v19 = vadd.f32 %v2529_v17, %v2522_v3 }
 0x10d   : > { %v391_v20 = vpop.f32.mrf.mxu1 }
 0x10e   : > { %v392_v21 = vadd.f32 %v391_v20, %v300_v4  ;;  %v2536_v22 = vpop.f32.mrf.mxu0 }
 0x10f   : > { %v481_v23 = vadd.f32 %v2536_v22, %v398_v19 }
 0x110   : > { %v473_v24 = vpop.f32.mrf.mxu0 }
 0x111   : > { %v474_v25 = vadd.f32 %v473_v24, %v392_v21  ;;  %v2543_v26 = vpop.f32.mrf.mxu1 }
 0x112   : > { %v564_v27 = vadd.f32 %v2543_v26, %v481_v23 }
 0x113   : > { %v555_v28 = vpop.f32.mrf.mxu1 }
 0x114   : > { %v556_v29 = vadd.f32 %v555_v28, %v474_v25  ;;  %v2550_v30 = vpop.f32.mrf.mxu0 }
 0x115   : > { %v647_v31 = vadd.f32 %v2550_v30, %v564_v27 }
 0x116   : > { %v640_v32 = vpop.f32.mrf.mxu0 }
 0x117   : > { %v641_v33 = vadd.f32 %v640_v32, %v556_v29  ;;  %v2557_v34 = vpop.f32.mrf.mxu1 }
 0x118   : > { %v726_v35 = vadd.f32 %v2557_v34, %v647_v31 }
 0x119   : > { %v719_v36 = vpop.f32.mrf.mxu1 }
 0x11a   : > { %v720_v37 = vadd.f32 %v719_v36, %v641_v33  ;;  %v2564_v38 = vpop.f32.mrf.mxu0 }
 0x11b   : > { %v819_v39 = vadd.f32 %v2564_v38, %v726_v35 }
 0x11c   : > { %v808_v40 = vpop.f32.mrf.mxu0 }
 0x11d   : > { %v809_v41 = vadd.f32 %v808_v40, %v720_v37  ;;  %v2571_v42 = vpop.f32.mrf.mxu1 }
 0x11e   : > { %v906_v43 = vadd.f32 %v2571_v42, %v819_v39 }
 0x11f   : > { %v899_v44 = vpop.f32.mrf.mxu1 }
 0x120   : > { %v900_v45 = vadd.f32 %v899_v44, %v809_v41  ;;  %v2578_v46 = vpop.f32.mrf.mxu0 }
 0x121   : > { %v989_v47 = vadd.f32 %v2578_v46, %v906_v43 }
 0x122   : > { %v981_v48 = vpop.f32.mrf.mxu0 }
 0x123   : > { %v982_v49 = vadd.f32 %v981_v48, %v900_v45  ;;  %v2585_v50 = vpop.f32.mrf.mxu1 }
 0x124   : > { %v1072_v51 = vadd.f32 %v2585_v50, %v989_v47 }
 0x125   : > { %v1063_v52 = vpop.f32.mrf.mxu1 }
 0x126   : > { %v1064_v53 = vadd.f32 %v1063_v52, %v982_v49  ;;  %v2592_v54 = vpop.f32.mrf.mxu0 }
 0x127   : > { %v1155_v55 = vadd.f32 %v2592_v54, %v1072_v51 }
 0x128   : > { %v1148_v56 = vpop.f32.mrf.mxu0 }
 0x129   : > { %v1149_v57 = vadd.f32 %v1148_v56, %v1064_v53  ;;  %v2599_v58 = vpop.f32.mrf.mxu1 }
 0x12a   : > { %v1234_v59 = vadd.f32 %v2599_v58, %v1155_v55 }
 0x12b   : > { %v1227_v60 = vpop.f32.mrf.mxu1 }
 0x12c   : > { %2406 = vst [vmem:[%s3287_s19 + $0x10] ss:$2 sm:$0xff] %v1234_v59  ;;  %v1228_v61 = vadd.f32 %v1227_v60, %v1149_v57  ;;  %v2606_v62 = vpop.f32.mrf.mxu0 }
 0x12e   : > { %1237 = vst [vmem:[%s3287_s19] ss:$2 sm:$0xff] %v1228_v61  ;;  %v1329_v63 = vpop.f32.mrf.mxu0 }
 0x12f   : > { %v2613_v0 = vpop.f32.mrf.mxu1 }
 0x130   : > { %v1427_v1 = vadd.f32 %v2613_v0, %v2606_v62 }
 0x131   : > { %v1420_v2 = vpop.f32.mrf.mxu1 }
 0x132   : > { %v1421_v5 = vadd.f32 %v1420_v2, %v1329_v63  ;;  %v2620_v6 = vpop.f32.mrf.mxu0 }
 0x133   : > { %v1510_v7 = vadd.f32 %v2620_v6, %v1427_v1 }
 0x134   : > { %v1502_v8 = vpop.f32.mrf.mxu0 }
 0x135   : > { %v1503_v10 = vadd.f32 %v1502_v8, %v1421_v5  ;;  %v2627_v12 = vpop.f32.mrf.mxu1 }
 0x136   : > { %v1593_v13 = vadd.f32 %v2627_v12, %v1510_v7 }
 0x137   : > { %v1584_v14 = vpop.f32.mrf.mxu1 }
 0x138   : > { %v1585_v9 = vadd.f32 %v1584_v14, %v1503_v10  ;;  %v2634_v11 = vpop.f32.mrf.mxu0 }
 0x139   : > { %v1676_v16 = vadd.f32 %v2634_v11, %v1593_v13 }
 0x13a   : > { %v1669_v15 = vpop.f32.mrf.mxu0 }
 0x13b   : > { %v1670_v18 = vadd.f32 %v1669_v15, %v1585_v9  ;;  %v2641_v3 = vpop.f32.mrf.mxu1 }
 0x13c   : > { %v1755_v4 = vadd.f32 %v2641_v3, %v1676_v16 }
 0x13d   : > { %v1748_v17 = vpop.f32.mrf.mxu1 }
 0x13e   : > { %v1749_v19 = vadd.f32 %v1748_v17, %v1670_v18  ;;  %v2648_v20 = vpop.f32.mrf.mxu0 }
 0x13f   : > { %v1848_v21 = vadd.f32 %v2648_v20, %v1755_v4 }
 0x140   : > { %v1837_v22 = vpop.f32.mrf.mxu0 }
 0x141   : > { %v1838_v23 = vadd.f32 %v1837_v22, %v1749_v19  ;;  %v2655_v24 = vpop.f32.mrf.mxu1 }
 0x142   : > { %v1935_v25 = vadd.f32 %v2655_v24, %v1848_v21 }
 0x143   : > { %v1928_v26 = vpop.f32.mrf.mxu1 }
 0x144   : > { %v1929_v27 = vadd.f32 %v1928_v26, %v1838_v23  ;;  %v2662_v28 = vpop.f32.mrf.mxu0 }
 0x145   : > { %v2018_v29 = vadd.f32 %v2662_v28, %v1935_v25 }
 0x146   : > { %v2010_v30 = vpop.f32.mrf.mxu0 }
 0x147   : > { %v2011_v31 = vadd.f32 %v2010_v30, %v1929_v27  ;;  %v2669_v32 = vpop.f32.mrf.mxu1 }
 0x148   : > { %v2101_v33 = vadd.f32 %v2669_v32, %v2018_v29 }
 0x149   : > { %v2092_v34 = vpop.f32.mrf.mxu1 }
 0x14a   : > { %v2093_v35 = vadd.f32 %v2092_v34, %v2011_v31  ;;  %v2676_v36 = vpop.f32.mrf.mxu0 }
 0x14b   : > { %v2184_v37 = vadd.f32 %v2676_v36, %v2101_v33 }
 0x14c   : > { %v2177_v38 = vpop.f32.mrf.mxu0 }
 0x14d   : > { %v2683_v39 = vpop.f32.mrf.mxu1  ;;  %v2178_v40 = vadd.f32 %v2177_v38, %v2093_v35 }
 0x14e   : > { %v2263_v41 = vadd.f32 %v2683_v39, %v2184_v37 }
 0x14f   : > { %v2256_v42 = vpop.f32.mrf.mxu1 }
 0x150   : > { %2412 = vst [vmem:[%s3287_s19 + $0x11] ss:$2 sm:$0xff] %v2263_v41  ;;  %v2257_v43 = vadd.f32 %v2256_v42, %v2178_v40 }
 0x152   : > { %2411 = vst [vmem:[%s3287_s19 + $0x1] ss:$2 sm:$0xff] %v2257_v43 }
 0x153   : > { %2828 = shalt.err (!%p2825_p5)
}
 0x154   : > { %s2829_s3 = scalar_lea.hbm %s3298_s26, 512  ;;  %s2833_s27 = scalar_lea.hbm %s3350_s2, 1024 }
 0x155   : > { %p2830_p7 = scmp.ne.s32.totalorder %s3298_s26, %s2829_s3  ;;  %p2834_p9 = scmp.lt.s32.totalorder %s3298_s26, %s3350_s2 }
 0x156   : > { %p2835_p11 = scmp.lt.s32.totalorder %s2833_s27, %s2829_s3 }
 0x157   : > { %p2831_p4 = pnand %p2830_p7, %p3013_p13 }
 0x158   : > { %p2836_p10 = por %p2835_p11, %p2834_p9 }
 0x159   : > { %p2832_p6 = pneg %p2831_p4 }
 0x15b   : > { %p2837_p1 = pnand %p2836_p10, %p2832_p6 }
 0x15d   : > { %2840 = shalt.err (!%p2837_p1)
}
 0x15e   : > { %s2906_s17 = smov 128   ;;  %s2907_s19 = smov 8  }
 0x15f   : > { %2690 = dma.vmem_to_hbm [thread:$0]  (%p3013_p13), %s3293_s21, 512, %s3298_s26, %s2271_s29, %s2906_s17, %s2906_s17, %s2907_s19  }
 0x160 PF: > { %s2303_s28 = sand.u32 1, %s2879_s9   ;;  %p3364_p8 = scmp.ne.s32.totalorder %s3356_s20, 0 }
 0x161   : > { %p3365_p12 = scmp.ge.s32.totalorder %s2899_s14, 2  ;;  %s2304_s23 = scalar_lea.sflag [#allocation4], %s2303_s28 }
 0x163   : > { %p2701_p0 = pnand %p3365_p12, %p3364_p8 }
 0x165   : > { %p2702_p2 = pneg %p2701_p0 }
 0x167   : > { %2874 = dma.done.wait (%p2702_p2), %s2304_s23, 512  }
 0x168   : > { %2876 = vsyncadd (%p2702_p2), %s2304_s23, 4294966784  ;;  %s19_s14 = sadd.s32 1, %s2899_s14   ;;  %s3366_s9 = smov %s2883_s10 }
 0x169   : > { %p16_p3 = scmp.ge.s32.totalorder %s19_s14, 4   ;;  %s3367_s10 = smov %s2887_s11 }
 0x16a   : > { %s3368_s11 = smov %s3022_s15  ;;  %s3369_s12 = smov %s2895_s13 }
 0x16b   : > { %s3370_s13 = smov %s3372_s25  ;;  %18 = sbr.rel (!%p16_p3) target bundleno = 7 (0x7), region = 84 }
 0x170   :  { %2309 = vsyncpa [#allocation3], 1 }
 0x171   :  { %2311 = vsyncpa [#allocation3 + $0x1], 1 }
 0x172   :  { %2312 = vsyncpa [#allocation6], 1 }
 0x173   :  { %2313 = vsyncpa [#allocation4], 1 }
 0x174   :  { %2315 = vsyncpa [#allocation4 + $0x1], 1 }

</bundles_post_ra>
